<compile_context>
chip_gen: v5e
topology: v5e:2x2
jax: 0.10.0
libtpu: 0.0.40
codegen_flags: <defaults>
</compile_context>

<pallas_src>
import functools

import jax
import jax.numpy as jnp
from jax.experimental import pallas as pl
from jax.experimental.pallas import tpu as pltpu


def _round_up(x, m):
    return (x + m - 1) // m * m


def _transe_kernel(l1_flag, ent_ref, rel_ref, out_ref):
    """One batch tile of TransE scores.

    ent_ref: (4, tile_b, D) rows = [pos_h, pos_t, neg_h, neg_t] embeddings
    rel_ref: (2, tile_b, D) rows = [pos_r, neg_r] embeddings
    out_ref: (2, tile_b)    rows = [pos_score, neg_score]  (lane-dense)
    """
    pos_d = ent_ref[0] + rel_ref[0] - ent_ref[1]
    neg_d = ent_ref[2] + rel_ref[1] - ent_ref[3]
    if l1_flag:  # static Python flag, baked into the kernel
        pos_s = jnp.sum(jnp.abs(pos_d), axis=1)
        neg_s = jnp.sum(jnp.abs(neg_d), axis=1)
    else:
        pos_s = jnp.sum(pos_d * pos_d, axis=1)
        neg_s = jnp.sum(neg_d * neg_d, axis=1)
    out_ref[0, :] = pos_s
    out_ref[1, :] = neg_s


def transe_forward(ent_emb, rel_emb,
                   pos_h, pos_t, pos_r, neg_h, neg_t, neg_r,
                   *, l1_flag=True, tile_b=1024):
    """Pallas implementation of TransEModel.forward -> (pos, neg), each (B,)."""
    B = pos_h.shape[0]
    D = ent_emb.shape[1]

    # Batch tile: multiple of 128 (lane-dense score output), capped at the
    # padded batch so small batches still form a single tile.
    tile = min(_round_up(tile_b, 128), _round_up(B, 128))
    b_pad = _round_up(B, tile)
    n_tiles = b_pad // tile

    def _pad(idx):
        return jnp.pad(idx, (0, b_pad - B))  # padded rows gather row 0 (harmless)

    # Two fused gathers instead of six; results are stacked so the kernel sees
    # two fat input streams.
    ent_idx = jnp.concatenate([_pad(pos_h), _pad(pos_t), _pad(neg_h), _pad(neg_t)])
    rel_idx = jnp.concatenate([_pad(pos_r), _pad(neg_r)])
    ent_g = jnp.take(ent_emb, ent_idx, axis=0).reshape(4, b_pad, D)
    rel_g = jnp.take(rel_emb, rel_idx, axis=0).reshape(2, b_pad, D)
    # TODO(synk): fusing the embedding gather itself into the kernel
    # (scalar-prefetched indices + per-row DMA) trades one HBM round-trip for
    # thousands of tiny DMA descriptors per tile; kept as an XLA gather here.

    out = pl.pallas_call(
        functools.partial(_transe_kernel, l1_flag),
        out_shape=jax.ShapeDtypeStruct((2, b_pad), jnp.float32),
        grid_spec=pltpu.PrefetchScalarGridSpec(
            num_scalar_prefetch=0,
            grid=(n_tiles,),
            in_specs=[
                pl.BlockSpec((4, tile, D), lambda i: (0, i, 0)),
                pl.BlockSpec((2, tile, D), lambda i: (0, i, 0)),
            ],
            out_specs=pl.BlockSpec((2, tile), lambda i: (0, i)),
        ),
        compiler_params=pltpu.CompilerParams(
            dimension_semantics=("parallel",),
            vmem_limit_bytes=48 * 1024 * 1024,
        ),
    )(ent_g, rel_g)

    return out[0, :B], out[1, :B]


# ----------------------------- test harness -----------------------------

def _xavier_uniform(key, shape):
    fan_in, fan_out = shape[0], shape[1]
    bound = (6.0 / (fan_in + fan_out)) ** 0.5
    return jax.random.uniform(key, shape, jnp.float32, -bound, bound)


def _l2_normalize_rows(w):
    return w / jnp.sqrt(jnp.sum(w * w, axis=1, keepdims=True))


def _reference(ent_emb, rel_emb, ph, pt, pr, nh, nt, nr, l1_flag=True):
    phe, pte, pre = ent_emb[ph], ent_emb[pt], rel_emb[pr]
    nhe, nte, nre = ent_emb[nh], ent_emb[nt], rel_emb[nr]
    if l1_flag:
        pos = jnp.sum(jnp.abs(phe + pre - pte), axis=1)
        neg = jnp.sum(jnp.abs(nhe + nre - nte), axis=1)
    else:
        pos = jnp.sum((phe + pre - pte) ** 2, axis=1)
        neg = jnp.sum((nhe + nre - nte) ** 2, axis=1)
    return pos, neg


def _run_case(ent_emb, rel_emb, key, batch_size, l1_flag, tile_b):
    entity_total, _ = ent_emb.shape
    relation_total, _ = rel_emb.shape
    k1, k2, k3, k4, k5, k6 = jax.random.split(key, 6)
    pos_h = jax.random.randint(k1, (batch_size,), 0, entity_total, jnp.int32)
    pos_t = jax.random.randint(k2, (batch_size,), 0, entity_total, jnp.int32)
    pos_r = jax.random.randint(k3, (batch_size,), 0, relation_total, jnp.int32)
    neg_h = jax.random.randint(k4, (batch_size,), 0, entity_total, jnp.int32)
    neg_t = jax.random.randint(k5, (batch_size,), 0, entity_total, jnp.int32)
    neg_r = jax.random.randint(k6, (batch_size,), 0, relation_total, jnp.int32)

    fwd = jax.jit(functools.partial(transe_forward, l1_flag=l1_flag, tile_b=tile_b))
    pos, neg = fwd(ent_emb, rel_emb, pos_h, pos_t, pos_r, neg_h, neg_t, neg_r)
    jax.block_until_ready((pos, neg))

    pos_ref, neg_ref = _reference(ent_emb, rel_emb,
                                  pos_h, pos_t, pos_r, neg_h, neg_t, neg_r,
                                  l1_flag=l1_flag)
    assert pos.shape == (batch_size,) and neg.shape == (batch_size,)
    assert jnp.allclose(pos, pos_ref, atol=1e-5, rtol=1e-5)
    assert jnp.allclose(neg, neg_ref, atol=1e-5, rtol=1e-5)


if __name__ == "__main__":
    # Small, deterministic config (mirrors the mocked TransE config fields).
    entity_total = 32
    relation_total = 8
    embedding_size = 32

    key = jax.random.PRNGKey(0)
    k_ent, k_rel, k_a, k_b = jax.random.split(key, 4)

    # Parameters: xavier_uniform then row-wise L2 normalization (as in __init__).
    ent_emb = _l2_normalize_rows(
        _xavier_uniform(k_ent, (entity_total, embedding_size)))
    rel_emb = _l2_normalize_rows(
        _xavier_uniform(k_rel, (relation_total, embedding_size)))

    # Case 1: small batch, L1 distance (single padded 128-row tile).
    _run_case(ent_emb, rel_emb, k_a, batch_size=16, l1_flag=True, tile_b=1024)
    # Case 2: non-multiple batch, L2 distance (padding + 2 grid steps).
    _run_case(ent_emb, rel_emb, k_b, batch_size=200, l1_flag=False, tile_b=128)

    print("KERNEL_OK")
</pallas_src>

<mosaic_0001>
module attributes {stable_mosaic.version = 11 : i64} {
  func.func @_transe_kernel(%arg0: i32, %arg1: memref<4x128x32xf32, #tpu.memory_space<vmem>>, %arg2: memref<2x128x32xf32, #tpu.memory_space<vmem>>, %arg3: memref<2x128xf32, #tpu.memory_space<vmem>>) attributes {dimension_semantics = [#tpu.dimension_semantics<parallel>], iteration_bounds = array<i64: 1>, scalar_prefetch = 0 : i64, scratch_operands = 0 : i64, tpu.core_type = #tpu.core_type<tc>, window_params = [{transform_indices = @transform_0, window_bounds = array<i64: 4, 128, 32>}, {transform_indices = @transform_1, window_bounds = array<i64: 2, 128, 32>}, {transform_indices = @transform_2, window_bounds = array<i64: 2, 128>}]} {
    %c0 = arith.constant 0 : index
    %c0_0 = arith.constant 0 : index
    %c0_1 = arith.constant 0 : index
    %0 = vector.load %arg1[%c0, %c0_0, %c0_1] : memref<4x128x32xf32, #tpu.memory_space<vmem>>, vector<1x128x32xf32>
    %1 = vector.shape_cast %0 : vector<1x128x32xf32> to vector<128x32xf32>
    %c0_2 = arith.constant 0 : index
    %c0_3 = arith.constant 0 : index
    %c0_4 = arith.constant 0 : index
    %2 = vector.load %arg2[%c0_2, %c0_3, %c0_4] : memref<2x128x32xf32, #tpu.memory_space<vmem>>, vector<1x128x32xf32>
    %3 = vector.shape_cast %2 : vector<1x128x32xf32> to vector<128x32xf32>
    %4 = arith.addf %1, %3 : vector<128x32xf32>
    %c1 = arith.constant 1 : index
    %c0_5 = arith.constant 0 : index
    %c0_6 = arith.constant 0 : index
    %5 = vector.load %arg1[%c1, %c0_5, %c0_6] : memref<4x128x32xf32, #tpu.memory_space<vmem>>, vector<1x128x32xf32>
    %6 = vector.shape_cast %5 : vector<1x128x32xf32> to vector<128x32xf32>
    %7 = arith.subf %4, %6 : vector<128x32xf32>
    %c2 = arith.constant 2 : index
    %c0_7 = arith.constant 0 : index
    %c0_8 = arith.constant 0 : index
    %8 = vector.load %arg1[%c2, %c0_7, %c0_8] : memref<4x128x32xf32, #tpu.memory_space<vmem>>, vector<1x128x32xf32>
    %9 = vector.shape_cast %8 : vector<1x128x32xf32> to vector<128x32xf32>
    %c1_9 = arith.constant 1 : index
    %c0_10 = arith.constant 0 : index
    %c0_11 = arith.constant 0 : index
    %10 = vector.load %arg2[%c1_9, %c0_10, %c0_11] : memref<2x128x32xf32, #tpu.memory_space<vmem>>, vector<1x128x32xf32>
    %11 = vector.shape_cast %10 : vector<1x128x32xf32> to vector<128x32xf32>
    %12 = arith.addf %9, %11 : vector<128x32xf32>
    %c3 = arith.constant 3 : index
    %c0_12 = arith.constant 0 : index
    %c0_13 = arith.constant 0 : index
    %13 = vector.load %arg1[%c3, %c0_12, %c0_13] : memref<4x128x32xf32, #tpu.memory_space<vmem>>, vector<1x128x32xf32>
    %14 = vector.shape_cast %13 : vector<1x128x32xf32> to vector<128x32xf32>
    %15 = arith.subf %12, %14 : vector<128x32xf32>
    %16 = math.absf %7 : vector<128x32xf32>
    %cst = arith.constant dense<0.000000e+00> : vector<128xf32>
    %17 = vector.multi_reduction <add>, %16, %cst [1] : vector<128x32xf32> to vector<128xf32>
    %18 = math.absf %15 : vector<128x32xf32>
    %cst_14 = arith.constant dense<0.000000e+00> : vector<128xf32>
    %19 = vector.multi_reduction <add>, %18, %cst_14 [1] : vector<128x32xf32> to vector<128xf32>
    %c0_15 = arith.constant 0 : index
    %c0_16 = arith.constant 0 : index
    %20 = vector.load %arg3[%c0_15, %c0_16] : memref<2x128xf32, #tpu.memory_space<vmem>>, vector<1x128xf32>
    %21 = vector.shape_cast %20 : vector<1x128xf32> to vector<128xf32>
    %22 = vector.shape_cast %17 : vector<128xf32> to vector<1x128xf32>
    tpu.vector_store %arg3[%c0_15, %c0_16], %22 {strides = array<i32>} : memref<2x128xf32, #tpu.memory_space<vmem>>, vector<1x128xf32>,
    %c1_17 = arith.constant 1 : index
    %c0_18 = arith.constant 0 : index
    %23 = vector.load %arg3[%c1_17, %c0_18] : memref<2x128xf32, #tpu.memory_space<vmem>>, vector<1x128xf32>
    %24 = vector.shape_cast %23 : vector<1x128xf32> to vector<128xf32>
    %25 = vector.shape_cast %19 : vector<128xf32> to vector<1x128xf32>
    tpu.vector_store %arg3[%c1_17, %c0_18], %25 {strides = array<i32>} : memref<2x128xf32, #tpu.memory_space<vmem>>, vector<1x128xf32>,
    return
  }
  func.func @transform_0(%arg0: i32) -> (i32, i32, i32) {
    %c0_i32 = arith.constant 0 : i32
    %c0_i32_0 = arith.constant 0 : i32
    %c0_i32_1 = arith.constant 0 : i32
    return %c0_i32, %arg0, %c0_i32_0 : i32, i32, i32
  }
  func.func @transform_1(%arg0: i32) -> (i32, i32, i32) {
    %c0_i32 = arith.constant 0 : i32
    %c0_i32_0 = arith.constant 0 : i32
    %c0_i32_1 = arith.constant 0 : i32
    return %c0_i32, %arg0, %c0_i32_0 : i32, i32, i32
  }
  func.func @transform_2(%arg0: i32) -> (i32, i32) {
    %c0_i32 = arith.constant 0 : i32
    %c0_i32_0 = arith.constant 0 : i32
    return %c0_i32, %arg0 : i32, i32
  }
}

</mosaic_0001>

<bundles_post_ra>
// kernel: transe_forward.1
= control target key start
LH: loop header
LB: loop body
LE: loop exit
PB: predicated region body
PF: predicated region fallthrough
CT: control target
= control target key end

     0   :  { %vm191_vm0 = vcmask 261120   ;;  %vm325_vm1 = vcmask 130112   ;;  %vm329_vm2 = vcmask 195712   ;;  %vm333_vm3 = vcmask 261312   ;;  %s904_s0 = inlined_call_operand.vmem [shape: f32[4,128,32], index: 0, kind: input, shape index: {}]   ;;  %s905_s1 = inlined_call_operand.vmem [shape: f32[2,128,32], index: 1, kind: input, shape index: {}]   ;;  %s906_s2 = inlined_call_operand.vmem [shape: f32[2,128], index: 2, kind: output, shape index: {}]  }
   0x1   :  { %v15_v0 = vld [vmem:[%s904_s0 + $0x20] sm:$0xff]  ;;  %v13_v4 = vld [vmem:[%s904_s0 + $0x10] sm:$0xff]  ;;  %v16_v13 = vld [vmem:[%s904_s0 + $0x28] sm:$0xff]  ;;  %vm337_vm4 = vcmask 326912   ;;  %vm341_vm5 = vcmask 392512   ;;  %vm345_vm6 = vcmask 458112  }
   0x2   :  { %v31_v1 = vld [vmem:[%s905_s1 + $0x20] sm:$0xff]  ;;  %v29_v5 = vld [vmem:[%s905_s1 + $0x10] sm:$0xff]  ;;  %v32_v14 = vld [vmem:[%s905_s1 + $0x28] sm:$0xff]  ;;  %vm349_vm7 = vcmask 523712   ;;  %vm353_vm8 = vcmask 589312   ;;  %vm357_vm9 = vcmask 654912  }
   0x3   :  { %v442_v2 = vld [vmem:[%s904_s0 + $0xa0] sm:$0xff]  ;;  %v47_v3 = vadd.f32 %v31_v1, %v15_v0  ;;  %v440_v6 = vld [vmem:[%s904_s0 + $0x90] sm:$0xff]  ;;  %v45_v7 = vadd.f32 %v29_v5, %v13_v4  ;;  %v443_v15 = vld [vmem:[%s904_s0 + $0xa8] sm:$0xff]  ;;  %v48_v17 = vadd.f32 %v32_v14, %v16_v13  ;;  %vm361_vm10 = vcmask 720512  }
   0x4   :  { %v11_v8 = vld [vmem:[%s904_s0] sm:$0xff]  ;;  %v14_v18 = vld [vmem:[%s904_s0 + $0x18] sm:$0xff]  ;;  %v12_v24 = vld [vmem:[%s904_s0 + $0x8] sm:$0xff]  ;;  %vm365_vm11 = vcmask 786112   ;;  %vm369_vm12 = vcmask 851712   ;;  %vm373_vm13 = vcmask 917312  }
   0x5   :  { %v27_v9 = vld [vmem:[%s905_s1] sm:$0xff]  ;;  %v80_v11 = vsub.f32 %v47_v3, %v442_v2  ;;  %v78_v16 = vsub.f32 %v45_v7, %v440_v6  ;;  %v30_v19 = vld [vmem:[%s905_s1 + $0x18] sm:$0xff]  ;;  %v28_v25 = vld [vmem:[%s905_s1 + $0x8] sm:$0xff]  ;;  %v81_v28 = vsub.f32 %v48_v17, %v443_v15  ;;  %vm377_vm14 = vcmask 982912  }
   0x6   :  { %v438_v10 = vld [vmem:[%s904_s0 + $0x80] sm:$0xff]  ;;  %v43_v12 = vadd.f32 %v27_v9, %v11_v8  ;;  %v441_v20 = vld [vmem:[%s904_s0 + $0x98] sm:$0xff]  ;;  %v46_v23 = vadd.f32 %v30_v19, %v14_v18  ;;  %v439_v26 = vld [vmem:[%s904_s0 + $0x88] sm:$0xff]  ;;  %v44_v29 = vadd.f32 %v28_v25, %v12_v24  ;;  %vm381_vm15 = vcmask 1048512  }
   0x7   :  { %v179_v21 = vand.u32 2147483647, %v80_v11  ;;  %v177_v27 = vand.u32 2147483647, %v78_v16  ;;  %v19_v30 = vld [vmem:[%s904_s0 + $0x40] sm:$0xff]  ;;  %v18_v35 = vld [vmem:[%s904_s0 + $0x38] sm:$0xff] }
   0x8   :  { %v76_v22 = vsub.f32 %v43_v12, %v438_v10  ;;  %v35_v31 = vld [vmem:[%s905_s1 + $0x40] sm:$0xff]  ;;  %v79_v34 = vsub.f32 %v46_v23, %v441_v20  ;;  %v34_v36 = vld [vmem:[%s905_s1 + $0x38] sm:$0xff]  ;;  %v77_v38 = vsub.f32 %v44_v29, %v439_v26  ;;  %v17_v39 = vld [vmem:[%s904_s0 + $0x30] sm:$0xff]  ;;  %v180_v42 = vand.u32 2147483647, %v81_v28 }
   0x9   :  { %v204_v32 = vsel %vm191_vm0, %v179_v21, 0.0  ;;  %v198_v37 = vsel %vm191_vm0, %v177_v27, 0.0  ;;  %v33_v40 = vld [vmem:[%s905_s1 + $0x30] sm:$0xff]  ;;  %v51_v43 = vadd.f32 %v35_v31, %v19_v30  ;;  %v446_v45 = vld [vmem:[%s904_s0 + $0xc0] sm:$0xff]  ;;  %v50_v46 = vadd.f32 %v34_v36, %v18_v35  ;;  %v445_v48 = vld [vmem:[%s904_s0 + $0xb8] sm:$0xff] }
   0xa   :  { %v175_v33 = vand.u32 2147483647, %v76_v22  ;;  %205 = vadd.xlane.f32.xlu2 %v204_v32  ;;  %199 = vadd.xlane.f32.xlu1 %v198_v37  ;;  %v178_v44 = vand.u32 2147483647, %v79_v34  ;;  %v176_v47 = vand.u32 2147483647, %v77_v38  ;;  %v49_v49 = vadd.f32 %v33_v40, %v17_v39 }
   0xb   :  { %v444_v50 = vld [vmem:[%s904_s0 + $0xb0] sm:$0xff]  ;;  %v207_v51 = vsel %vm191_vm0, %v180_v42, 0.0  ;;  %v84_v52 = vsub.f32 %v51_v43, %v446_v45  ;;  %v83_v54 = vsub.f32 %v50_v46, %v445_v48  ;;  %v22_v55 = vld [vmem:[%s904_s0 + $0x58] sm:$0xff]  ;;  %v20_v61 = vld [vmem:[%s904_s0 + $0x48] sm:$0xff] }
   0xc   :  { %v192_v41 = vsel %vm191_vm0, %v175_v33, 0.0  ;;  %v201_v53 = vsel %vm191_vm0, %v178_v44, 0.0  ;;  %v38_v56 = vld [vmem:[%s905_s1 + $0x58] sm:$0xff]  ;;  %v195_v57 = vsel %vm191_vm0, %v176_v47, 0.0  ;;  %v82_v58 = vsub.f32 %v49_v49, %v444_v50  ;;  %v21_v59 = vld [vmem:[%s904_s0 + $0x50] sm:$0xff]  ;;  %v36_v62 = vld [vmem:[%s905_s1 + $0x48] sm:$0xff] }
   0xd   :  { %193 = vadd.xlane.f32.xlu0 %v192_v41  ;;  %v37_v60 = vld [vmem:[%s905_s1 + $0x50] sm:$0xff]  ;;  %v183_v63 = vand.u32 2147483647, %v84_v52  ;;  %v54_v0 = vadd.f32 %v38_v56, %v22_v55  ;;  %v182_v1 = vand.u32 2147483647, %v83_v54  ;;  %v449_v2 = vld [vmem:[%s904_s0 + $0xd8] sm:$0xff]  ;;  %v52_v6 = vadd.f32 %v36_v62, %v20_v61 }
   0xe   :  { %v53_v3 = vadd.f32 %v37_v60, %v21_v59  ;;  %v181_v4 = vand.u32 2147483647, %v82_v58  ;;  %v448_v5 = vld [vmem:[%s904_s0 + $0xd0] sm:$0xff]  ;;  %v447_v7 = vld [vmem:[%s904_s0 + $0xc8] sm:$0xff]  ;;  %v454_v16 = vld [vmem:[%s904_s0 + $0x100] sm:$0xff] }
   0xf   :  { %v216_v8 = vsel %vm191_vm0, %v183_v63, 0.0  ;;  %v87_v9 = vsub.f32 %v54_v0, %v449_v2  ;;  %v213_v10 = vsel %vm191_vm0, %v182_v1, 0.0  ;;  %v455_v12 = vld [vmem:[%s904_s0 + $0x108] sm:$0xff]  ;;  %v85_v15 = vsub.f32 %v52_v6, %v447_v7  ;;  %v470_v17 = vld [vmem:[%s905_s1 + $0x80] sm:$0xff]  ;;  %v457_v37 = vld [vmem:[%s904_s0 + $0x118] sm:$0xff] }
  0x10   :  { %v86_v11 = vsub.f32 %v53_v3, %v448_v5  ;;  %v471_v13 = vld [vmem:[%s905_s1 + $0x88] sm:$0xff]  ;;  %v210_v14 = vsel %vm191_vm0, %v181_v4, 0.0  ;;  %v23_v18 = vld [vmem:[%s904_s0 + $0x60] sm:$0xff]  ;;  %v126_v24 = vadd.f32 %v470_v17, %v454_v16  ;;  %v473_v38 = vld [vmem:[%s905_s1 + $0x98] sm:$0xff] }
  0x11   :  { %v39_v19 = vld [vmem:[%s905_s1 + $0x60] sm:$0xff]  ;;  %v186_v20 = vand.u32 2147483647, %v87_v9  ;;  %v127_v21 = vadd.f32 %v471_v13, %v455_v12  ;;  %v487_v23 = vld [vmem:[%s904_s0 + $0x188] sm:$0xff]  ;;  %v184_v25 = vand.u32 2147483647, %v85_v15  ;;  %v129_v46 = vadd.f32 %v473_v38, %v457_v37 }
  0x12   :  { %208 = vadd.xlane.f32.xlu2 %v207_v51  ;;  %202 = vadd.xlane.f32.xlu1 %v201_v53  ;;  %v185_v22 = vand.u32 2147483647, %v86_v11  ;;  %v486_v26 = vld [vmem:[%s904_s0 + $0x180] sm:$0xff]  ;;  %v55_v27 = vadd.f32 %v39_v19, %v23_v18  ;;  %v456_v39 = vld [vmem:[%s904_s0 + $0x110] sm:$0xff]  ;;  %v489_v44 = vld [vmem:[%s904_s0 + $0x198] sm:$0xff] }
  0x13   :  { %v450_v28 = vld [vmem:[%s904_s0 + $0xe0] sm:$0xff]  ;;  %v225_v29 = vsel %vm191_vm0, %v186_v20, 0.0  ;;  %v160_v30 = vsub.f32 %v127_v21, %v487_v23  ;;  %v159_v32 = vsub.f32 %v126_v24, %v486_v26  ;;  %v219_v35 = vsel %vm191_vm0, %v184_v25, 0.0  ;;  %v472_v40 = vld [vmem:[%s905_s1 + $0x90] sm:$0xff]  ;;  %v24_v48 = vld [vmem:[%s904_s0 + $0x68] sm:$0xff] }
  0x14   :  { %v222_v31 = vsel %vm191_vm0, %v185_v22, 0.0  ;;  %v458_v33 = vld [vmem:[%s904_s0 + $0x120] sm:$0xff]  ;;  %v88_v36 = vsub.f32 %v55_v27, %v450_v28  ;;  %v488_v47 = vld [vmem:[%s904_s0 + $0x190] sm:$0xff]  ;;  %v40_v49 = vld [vmem:[%s905_s1 + $0x68] sm:$0xff]  ;;  %v128_v52 = vadd.f32 %v472_v40, %v456_v39  ;;  %v162_v2 = vsub.f32 %v129_v46, %v489_v44 }
  0x15   :  { %196 = vadd.xlane.f32.xlu0 %v195_v57  ;;  %v474_v34 = vld [vmem:[%s905_s1 + $0xa0] sm:$0xff]  ;;  %v241_v41 = vand.u32 2147483647, %v160_v30  ;;  %v240_v45 = vand.u32 2147483647, %v159_v32  ;;  %v451_v50 = vld [vmem:[%s904_s0 + $0xe8] sm:$0xff]  ;;  %v56_v53 = vadd.f32 %v40_v49, %v24_v48 }
  0x16   :  { %v130_v42 = vadd.f32 %v474_v34, %v458_v33  ;;  %v490_v43 = vld [vmem:[%s904_s0 + $0x1a0] sm:$0xff]  ;;  %v187_v51 = vand.u32 2147483647, %v88_v36  ;;  %v465_v56 = vld [vmem:[%s904_s0 + $0x158] sm:$0xff]  ;;  %v161_v7 = vsub.f32 %v128_v52, %v488_v47  ;;  %v476_v9 = vld [vmem:[%s905_s1 + $0xb0] sm:$0xff] }
  0x17   :  { %v466_v54 = vld [vmem:[%s904_s0 + $0x160] sm:$0xff]  ;;  %v481_v59 = vld [vmem:[%s905_s1 + $0xd8] sm:$0xff]  ;;  %v259_v61 = vsel %vm191_vm0, %v241_v41, 0.0  ;;  %v89_v63 = vsub.f32 %v56_v53, %v451_v50  ;;  %v256_v1 = vsel %vm191_vm0, %v240_v45, 0.0  ;;  %v459_v13 = vld [vmem:[%s904_s0 + $0x128] sm:$0xff] }
  0x18   :  { %v482_v55 = vld [vmem:[%s905_s1 + $0xe0] sm:$0xff]  ;;  %v497_v60 = vld [vmem:[%s904_s0 + $0x1d8] sm:$0xff]  ;;  %v163_v62 = vsub.f32 %v130_v42, %v490_v43  ;;  %v137_v0 = vadd.f32 %v481_v59, %v465_v56  ;;  %v228_v6 = vsel %vm191_vm0, %v187_v51, 0.0  ;;  %v492_v18 = vld [vmem:[%s904_s0 + $0x1b0] sm:$0xff]  ;;  %v243_v21 = vand.u32 2147483647, %v162_v2 }
  0x19   :  { %v138_v57 = vadd.f32 %v482_v55, %v466_v54  ;;  %v498_v58 = vld [vmem:[%s904_s0 + $0x1e0] sm:$0xff]  ;;  %v461_v3 = vld [vmem:[%s904_s0 + $0x138] sm:$0xff]  ;;  %v25_v24 = vld [vmem:[%s904_s0 + $0x70] sm:$0xff]  ;;  %v242_v27 = vand.u32 2147483647, %v161_v7 }
  0x1a   :  { %217 = vadd.xlane.f32.xlu2 %v216_v8  ;;  %214 = vadd.xlane.f32.xlu1 %v213_v10  ;;  %v477_v4 = vld [vmem:[%s905_s1 + $0xb8] sm:$0xff]  ;;  %v460_v8 = vld [vmem:[%s904_s0 + $0x130] sm:$0xff]  ;;  %v188_v10 = vand.u32 2147483647, %v89_v63  ;;  %v170_v11 = vsub.f32 %v137_v0, %v497_v60  ;;  %v244_v16 = vand.u32 2147483647, %v163_v62 }
  0x1b   :  { %v171_v5 = vsub.f32 %v138_v57, %v498_v58  ;;  %v493_v12 = vld [vmem:[%s904_s0 + $0x1b8] sm:$0xff]  ;;  %v133_v17 = vadd.f32 %v477_v4, %v461_v3  ;;  %v132_v22 = vadd.f32 %v476_v9, %v460_v8  ;;  %v41_v25 = vld [vmem:[%s905_s1 + $0x70] sm:$0xff]  ;;  %v483_v32 = vld [vmem:[%s905_s1 + $0xe8] sm:$0xff]  ;;  %v265_v43 = vsel %vm191_vm0, %v243_v21, 0.0 }
  0x1c   :  { %v746_v19 = vsel %vm191_vm0, %v188_v10, 0.0  ;;  %v251_v20 = vand.u32 2147483647, %v170_v11  ;;  %v452_v26 = vld [vmem:[%s904_s0 + $0xf0] sm:$0xff]  ;;  %v57_v30 = vadd.f32 %v41_v25, %v25_v24  ;;  %v491_v34 = vld [vmem:[%s904_s0 + $0x1a8] sm:$0xff]  ;;  %v268_v38 = vsel %vm191_vm0, %v244_v16, 0.0 }
  0x1d   :  { %211 = vadd.xlane.f32.xlu0 %v210_v14  ;;  %v475_v14 = vld [vmem:[%s905_s1 + $0xa8] sm:$0xff]  ;;  %v252_v15 = vand.u32 2147483647, %v171_v5  ;;  %v468_v33 = vld [vmem:[%s904_s0 + $0x170] sm:$0xff]  ;;  %v166_v39 = vsub.f32 %v133_v17, %v493_v12  ;;  %v165_v44 = vsub.f32 %v132_v22, %v492_v18  ;;  %v262_v48 = vsel %vm191_vm0, %v242_v27, 0.0  ;;  %v462_v54 = vld [vmem:[%s904_s0 + $0x140] sm:$0xff] }
  0x1e   :  { %v131_v28 = vadd.f32 %v475_v14, %v459_v13  ;;  %v499_v36 = vld [vmem:[%s904_s0 + $0x1e8] sm:$0xff]  ;;  %v484_v37 = vld [vmem:[%s905_s1 + $0xf0] sm:$0xff]  ;;  %v90_v40 = vsub.f32 %v57_v30, %v452_v26  ;;  %v478_v55 = vld [vmem:[%s905_s1 + $0xc0] sm:$0xff] }
  0x1f   :  { %v749_v23 = vsel %vm191_vm0, %v252_v15, 0.0  ;;  %v140_v41 = vadd.f32 %v484_v37, %v468_v33  ;;  %v500_v42 = vld [vmem:[%s904_s0 + $0x1f0] sm:$0xff]  ;;  %v463_v50 = vld [vmem:[%s904_s0 + $0x148] sm:$0xff]  ;;  %v247_v57 = vand.u32 2147483647, %v166_v39  ;;  %v485_v2 = vld [vmem:[%s905_s1 + $0xf8] sm:$0xff] }
  0x20   :  { %v464_v45 = vld [vmem:[%s904_s0 + $0x150] sm:$0xff]  ;;  %v164_v49 = vsub.f32 %v131_v28, %v491_v34  ;;  %v479_v51 = vld [vmem:[%s905_s1 + $0xc8] sm:$0xff]  ;;  %v189_v52 = vand.u32 2147483647, %v90_v40  ;;  %v246_v62 = vand.u32 2147483647, %v165_v44 }
  0x21   :  { %v480_v46 = vld [vmem:[%s905_s1 + $0xd0] sm:$0xff]  ;;  %v173_v53 = vsub.f32 %v140_v41, %v500_v42  ;;  %v135_v63 = vadd.f32 %v479_v51, %v463_v50  ;;  %v501_v3 = vld [vmem:[%s904_s0 + $0x1f8] sm:$0xff]  ;;  %v495_v5 = vld [vmem:[%s904_s0 + $0x1c8] sm:$0xff]  ;;  %v277_v14 = vsel %vm191_vm0, %v247_v57, 0.0 }
  0x22   :  { %226 = vadd.xlane.f32.xlu2 %v225_v29  ;;  %223 = vadd.xlane.f32.xlu1 %v222_v31  ;;  %v761_v29 = vsel %vm191_vm0, %v251_v20, 0.0  ;;  %v467_v31 = vld [vmem:[%s904_s0 + $0x168] sm:$0xff]  ;;  %v136_v58 = vadd.f32 %v480_v46, %v464_v45  ;;  %v496_v59 = vld [vmem:[%s904_s0 + $0x1d0] sm:$0xff]  ;;  %v234_v60 = vsel %vm191_vm0, %v189_v52, 0.0  ;;  %v245_v4 = vand.u32 2147483647, %v164_v49 }
  0x23   :  { %v26_v9 = vld [vmem:[%s904_s0 + $0x78] sm:$0xff]  ;;  %v494_v11 = vld [vmem:[%s904_s0 + $0x1c0] sm:$0xff]  ;;  %v274_v17 = vsel %vm191_vm0, %v246_v62, 0.0  ;;  %v168_v18 = vsub.f32 %v135_v63, %v495_v5 }
  0x24   :  { %v42_v10 = vld [vmem:[%s905_s1 + $0x78] sm:$0xff]  ;;  %v169_v15 = vsub.f32 %v136_v58, %v496_v59  ;;  %v271_v21 = vsel %vm191_vm0, %v245_v4, 0.0 }
  0x25   :  { %220 = vadd.xlane.f32.xlu0 %v219_v35  ;;  %v139_v35 = vadd.f32 %v483_v32, %v467_v31  ;;  %v58_v12 = vadd.f32 %v42_v10, %v26_v9  ;;  %v453_v13 = vld [vmem:[%s904_s0 + $0xf8] sm:$0xff]  ;;  %v249_v28 = vand.u32 2147483647, %v168_v18 }
  0x26   :  { %v250_v26 = vand.u32 2147483647, %v169_v15 }
  0x27   :  { %v172_v47 = vsub.f32 %v139_v35, %v499_v36  ;;  %v91_v20 = vsub.f32 %v58_v12, %v453_v13  ;;  %v283_v33 = vsel %vm191_vm0, %v249_v28, 0.0  ;;  %v320_v35 = vlaneseq }
  0x28   :  { %v286_v32 = vsel %vm191_vm0, %v250_v26, 0.0 }
  0x29   :  { %v253_v56 = vand.u32 2147483647, %v172_v47  ;;  %v190_v25 = vand.u32 2147483647, %v91_v20  ;;  %v846_v39 = vand.u32 127, %v320_v35 }
  0x2a   :  { %260 = vadd.xlane.f32.xlu2 %v259_v61  ;;  %257 = vadd.xlane.f32.xlu1 %v256_v1  ;;  %v254_v61 = vand.u32 2147483647, %v173_v53  ;;  %v469_v1 = vld [vmem:[%s904_s0 + $0x178] sm:$0xff] }
  0x2b   :  { %v295_v0 = vsel %vm191_vm0, %v253_v56, 0.0  ;;  %v141_v8 = vadd.f32 %v485_v2, %v469_v1  ;;  %v237_v30 = vsel %vm191_vm0, %v190_v25, 0.0  ;;  %v323_v40 = vadd.s32 4294967288, %v846_v39 }
  0x2c   :  { %v298_v7 = vsel %vm191_vm0, %v254_v61, 0.0  ;;  %v327_v41 = vadd.s32 4294967280, %v846_v39  ;;  %v331_v1 = vadd.s32 4294967272, %v846_v39  ;;  %v335_v4 = vadd.s32 4294967264, %v846_v39 }
  0x2d   :  { %229 = vadd.xlane.f32.xlu0 %v228_v6  ;;  %v134_v6 = vadd.f32 %v478_v55, %v462_v54  ;;  %v174_v16 = vsub.f32 %v141_v8, %v501_v3  ;;  %v347_v20 = vadd.s32 4294967240, %v846_v39 }
  0x2f   :  { %v167_v22 = vsub.f32 %v134_v6, %v494_v11  ;;  %v255_v24 = vand.u32 2147483647, %v174_v16  ;;  %v339_v6 = vadd.s32 4294967256, %v846_v39 }
  0x31   :  { %v301_v27 = vsel %vm191_vm0, %v255_v24, 0.0  ;;  %v248_v31 = vand.u32 2147483647, %v167_v22  ;;  %v351_v24 = vadd.s32 4294967232, %v846_v39 }
  0x32   :  { %269 = vadd.xlane.f32.xlu2 %v268_v38  ;;  %266 = vadd.xlane.f32.xlu1 %v265_v43 }
  0x33   :  { %v280_v34 = vsel %vm191_vm0, %v248_v31, 0.0 }
  0x35   :  { %263 = vadd.xlane.f32.xlu0 %v262_v48 }
  0x3a   :  { %278 = vadd.xlane.f32.xlu2 %v277_v14  ;;  %275 = vadd.xlane.f32.xlu1 %v274_v17  ;;  %v343_v14 = vadd.s32 4294967248, %v846_v39 }
  0x3d   :  { %272 = vadd.xlane.f32.xlu0 %v271_v21 }
  0x42   :  { %287 = vadd.xlane.f32.xlu2 %v286_v32  ;;  %284 = vadd.xlane.f32.xlu1 %v283_v33  ;;  %v355_v32 = vadd.s32 4294967224, %v846_v39 }
  0x45   :  { %281 = vadd.xlane.f32.xlu0 %v280_v34 }
  0x4a   :  { %232 = vadd.xlane.f32.xlu2 %v746_v19  ;;  %293 = vadd.xlane.f32.xlu1 %v749_v23 }
  0x4d   :  { %290 = vadd.xlane.f32.xlu0 %v761_v29 }
  0x52   :  { %299 = vadd.xlane.f32.xlu2 %v298_v7  ;;  %235 = vadd.xlane.f32.xlu1 %v234_v60 }
  0x55   :  { %296 = vadd.xlane.f32.xlu0 %v295_v0 }
  0x5a   :  { %302 = vadd.xlane.f32.xlu1 %v301_v27 }
  0x5d   :  { %238 = vadd.xlane.f32.xlu0 %v237_v30 }
  0x7d   :  { %v206_v36 = vpop.xlane.xlu2 %205  ;;  %v200_v37 = vpop.xlane.xlu1 %199 }
  0x7e   :  { %v328_v44 = vperm.slane %v200_v37, %v327_v41  ;;  %v336_v18 = vperm.slane %v206_v36, %v335_v4 }
  0x80   :  { %v194_v38 = vpop.xlane.xlu0 %193 }
  0x81   :  { %v322_v42 = vperm.slane %v194_v38, %v846_v39 }
  0x85   :  { %v850_v19 = vpop.xlane.xlu2 %208  ;;  %v203_v23 = vpop.xlane.xlu1 %202 }
  0x86   :  { %v332_v13 = vperm.slane %v203_v23, %v331_v1  ;;  %v340_v22 = vperm.slane %v850_v19, %v339_v6 }
  0x88   :  { %v197_v29 = vpop.xlane.xlu0 %196 }
  0x89   :  { %v324_v43 = vperm.slane %v197_v29, %v323_v40  ;;  %v363_v29 = vadd.s32 4294967208, %v846_v39 }
  0x8b   :  { %v326_v45 = vsel %vm325_vm1, %v324_v43, %v322_v42 }
  0x8c   :  { %v330_v46 = vsel %vm329_vm2, %v328_v44, %v326_v45 }
  0x8d   :  { %v855_v47 = vpop.xlane.xlu2 %217  ;;  %v857_v48 = vpop.xlane.xlu1 %214  ;;  %v334_v15 = vsel %vm333_vm3, %v332_v13, %v330_v46 }
  0x8e   :  { %v338_v25 = vsel %vm337_vm4, %v336_v18, %v334_v15  ;;  %v348_v35 = vperm.slane %v857_v48, %v347_v20  ;;  %v352_v23 = vperm.slane %v855_v47, %v351_v24  ;;  %v367_v48 = vadd.s32 4294967200, %v846_v39 }
  0x8f   :  { %v342_v36 = vsel %vm341_vm5, %v340_v22, %v338_v25  ;;  %v371_v47 = vadd.s32 4294967192, %v846_v39 }
  0x90   :  { %v212_v49 = vpop.xlane.xlu0 %211 }
  0x91   :  { %v344_v26 = vperm.slane %v212_v49, %v343_v14 }
  0x93   :  { %v346_v37 = vsel %vm345_vm6, %v344_v26, %v342_v36 }
  0x94   :  { %v350_v42 = vsel %vm349_vm7, %v348_v35, %v346_v37 }
  0x95   :  { %v859_v50 = vpop.xlane.xlu2 %226  ;;  %v861_v51 = vpop.xlane.xlu1 %223 }
  0x98   :  { %v863_v52 = vpop.xlane.xlu0 %220 }
  0x99   :  { %v356_v43 = vperm.slane %v863_v52, %v355_v32  ;;  %v375_v52 = vadd.s32 4294967184, %v846_v39 }
  0x9d   :  { %v261_v53 = vpop.xlane.xlu2 %260  ;;  %v258_v54 = vpop.xlane.xlu1 %257 }
  0x9e   :  { %v402_v61 = vperm.slane %v261_v53, %v323_v40  ;;  %v401_v62 = vperm.slane %v258_v54, %v846_v39  ;;  %v354_v54 = vsel %vm353_vm8, %v352_v23, %v350_v42 }
  0xa0   :  { %v865_v55 = vpop.xlane.xlu0 %229  ;;  %v403_v2 = vsel %vm325_vm1, %v402_v61, %v401_v62 }
  0xa5   :  { %v270_v56 = vpop.xlane.xlu2 %269  ;;  %v267_v57 = vpop.xlane.xlu1 %266 }
  0xa6   :  { %v406_v3 = vperm.slane %v267_v57, %v331_v1  ;;  %v408_v8 = vperm.slane %v270_v56, %v335_v4  ;;  %v358_v57 = vsel %vm357_vm9, %v356_v43, %v354_v54  ;;  %v379_v1 = vadd.s32 4294967176, %v846_v39 }
  0xa8   :  { %v264_v58 = vpop.xlane.xlu0 %263 }
  0xa9   :  { %v404_v0 = vperm.slane %v264_v58, %v327_v41  ;;  %v359_v41 = vadd.s32 4294967216, %v846_v39 }
  0xab   :  { %v405_v5 = vsel %vm329_vm2, %v404_v0, %v403_v2  ;;  %v360_v53 = vperm.slane %v861_v51, %v359_v41  ;;  %v368_v0 = vperm.slane %v865_v55, %v367_v48 }
  0xac   :  { %v407_v10 = vsel %vm333_vm3, %v406_v3, %v405_v5 }
  0xad   :  { %v279_v59 = vpop.xlane.xlu2 %278  ;;  %v276_v60 = vpop.xlane.xlu1 %275  ;;  %v409_v17 = vsel %vm337_vm4, %v408_v8, %v407_v10  ;;  %v362_v51 = vsel %vm361_vm10, %v360_v53, %v358_v57 }
  0xae   :  { %v412_v16 = vperm.slane %v276_v60, %v343_v14  ;;  %v414_v27 = vperm.slane %v279_v59, %v347_v20 }
  0xb0   :  { %v273_v63 = vpop.xlane.xlu0 %272 }
  0xb1   :  { %v410_v11 = vperm.slane %v273_v63, %v339_v6  ;;  %v364_v63 = vperm.slane %v859_v50, %v363_v29 }
  0xb3   :  { %v411_v21 = vsel %vm341_vm5, %v410_v11, %v409_v17 }
  0xb4   :  { %v413_v28 = vsel %vm345_vm6, %v412_v16, %v411_v21 }
  0xb5   :  { %v288_v7 = vpop.xlane.xlu2 %287  ;;  %v285_v9 = vpop.xlane.xlu1 %284  ;;  %v415_v40 = vsel %vm349_vm7, %v414_v27, %v413_v28 }
  0xb6   :  { %v418_v38 = vperm.slane %v285_v9, %v355_v32  ;;  %v420_v44 = vperm.slane %v288_v7, %v359_v41  ;;  %v366_v7 = vsel %vm365_vm11, %v364_v63, %v362_v51 }
  0xb7   :  { %v370_v9 = vsel %vm369_vm12, %v368_v0, %v366_v7 }
  0xb8   :  { %v282_v12 = vpop.xlane.xlu0 %281 }
  0xb9   :  { %v416_v30 = vperm.slane %v282_v12, %v351_v24 }
  0xbb   :  { %v417_v19 = vsel %vm353_vm8, %v416_v30, %v415_v40 }
  0xbc   :  { %v419_v45 = vsel %vm357_vm9, %v418_v38, %v417_v19 }
  0xbd   :  { %v294_v31 = vpop.xlane.xlu1 %293  ;;  %v233_v33 = vpop.xlane.xlu2 %232  ;;  %v421_v59 = vsel %vm361_vm10, %v420_v44, %v419_v45 }
  0xbe   :  { %v424_v58 = vperm.slane %v294_v31, %v367_v48  ;;  %v372_v2 = vperm.slane %v233_v33, %v371_v47 }
  0xc0   :  { %v291_v34 = vpop.xlane.xlu0 %290  ;;  %v374_v11 = vsel %vm373_vm13, %v372_v2, %v370_v9 }
  0xc1   :  { %v422_v46 = vperm.slane %v291_v34, %v363_v29 }
  0xc3   :  { %v423_v60 = vsel %vm365_vm11, %v422_v46, %v421_v59 }
  0xc4   :  { %v425_v3 = vsel %vm369_vm12, %v424_v58, %v423_v60 }
  0xc5   :  { %v236_v49 = vpop.xlane.xlu1 %235  ;;  %v300_v62 = vpop.xlane.xlu2 %299 }
  0xc6   :  { %v428_v4 = vperm.slane %v300_v62, %v375_v52  ;;  %v376_v5 = vperm.slane %v236_v49, %v375_v52 }
  0xc8   :  { %v297_v56 = vpop.xlane.xlu0 %296  ;;  %v378_v55 = vsel %vm377_vm14, %v376_v5, %v374_v11 }
  0xc9   :  { %v426_v61 = vperm.slane %v297_v56, %v371_v47 }
  0xcb   :  { %v427_v6 = vsel %vm373_vm13, %v426_v61, %v425_v3 }
  0xcc   :  { %v429_v12 = vsel %vm377_vm14, %v428_v4, %v427_v6 }
  0xcd   :  { %v303_v8 = vpop.xlane.xlu1 %302 }
  0xce   :  { %v430_v50 = vperm.slane %v303_v8, %v379_v1 }
  0xd0   :  { %v239_v10 = vpop.xlane.xlu0 %238  ;;  %v431_v14 = vsel %vm381_vm15, %v430_v50, %v429_v12 }
  0xd1   :  { %v380_v13 = vperm.slane %v239_v10, %v379_v1  ;;  %433 = vst [vmem:[%s906_s2 + $0x1] sm:$0x1] %v431_v14 }
  0xd3   :  { %v382_v39 = vsel %vm381_vm15, %v380_v13, %v378_v55 }
  0xd4   :  { %384 = vst [vmem:[%s906_s2] sm:$0x1] %v382_v39 }

</bundles_post_ra>
